<compile_context>
chip_gen: v6e
topology: v6e:2x2x1
jax: 0.10.0
libtpu: 0.0.40
codegen_flags: <defaults>
</compile_context>

<pallas_src>
import numpy as np
import jax
import jax.numpy as jnp
from jax.experimental import pallas as pl
from jax.experimental.pallas import tpu as pltpu


def _feature_dropout_kernel(x_ref, noise_ref, starts_ref, ends_ref, o_ref):
    # x_ref:      (TL, k*F)   k-folded input rows of this tile
    # noise_ref:  (Bp, F)     full noise table (resident, DMA'd once)
    # starts_ref: (1, Bp)     segment start row (original row index)
    # ends_ref:   (1, Bp)     segment end row (exclusive)
    # o_ref:      (TL, k*F)   output rows
    TL, kF = x_ref.shape
    Bp, F = noise_ref.shape
    k = kF // F

    x = x_ref[...]
    noise = noise_ref[...]
    starts = starts_ref[...]                      # (1, Bp)
    ends = ends_ref[...]                          # (1, Bp)
    row0 = pl.program_id(0) * (TL * k)            # first original row of tile

    cols = []
    for j in range(k):                            # static, k = 1 for F >= 128
        # original row index of (folded row g, sub-row j), broadcast over Bp
        ridx = jax.lax.broadcasted_iota(jnp.int32, (TL, Bp), 0) * k + (row0 + j)
        onehot = ((ridx >= starts) & (ridx < ends)).astype(noise.dtype)
        # gather each row's noise via the (otherwise idle) MXU; exact values
        nrow = jnp.dot(onehot, noise,
                       preferred_element_type=jnp.float32).astype(x.dtype)
        cols.append(x[:, j * F:(j + 1) * F] * nrow)
    o_ref[...] = cols[0] if k == 1 else jnp.concatenate(cols, axis=-1)


def make_noise(key, batch_size, num_features, p):
    """Equivalent of ctx.noise in the PyTorch forward (deterministic via key)."""
    if p == 1.0:
        return jnp.zeros((batch_size, num_features), jnp.float32)
    keep = jax.random.bernoulli(key, 1.0 - p, (batch_size, num_features))
    return keep.astype(jnp.float32) / (1.0 - p)


def feature_dropout(x, lengths, noise, *, p=0.5, train=True,
                    block_bytes=2 << 20):
    """Forward pass of FeatureDropout.

    x:       (L, F) float array; rows of batch element b are contiguous.
    lengths: python sequence of per-batch-element row counts (sum == L); this
             is the static structure carried by the module's `batch_idxs`.
    noise:   (B, F) float mask from make_noise().
    block_bytes: target bytes moved per grid step per direction (the tuning
             knob).  ~1-2 MiB keeps the kernel at ~85%+ of HBM roofline on
             v5e/v6e/v7x while the double buffers stay far under v7x's 64 MiB.
    """
    if p < 0.0 or p > 1.0:
        raise ValueError(
            "dropout probability has to be between 0 and 1, but got {}".format(p))
    L, F = x.shape
    if p == 0.0 or not train or L == 0:
        return x                                   # PyTorch eval / p=0 path (clone)

    lengths = [int(n) for n in lengths]
    if sum(lengths) != L:
        raise ValueError("sum(lengths) must equal x.shape[0]")
    B = len(lengths)
    assert noise.shape == (B, F)

    # PyTorch builds the mask in the input dtype; multiply in that dtype too.
    noise = noise.astype(x.dtype)

    # Lane-fold when F < 128 so stores stay lane-dense (no masked vst).
    k = 1
    if F < 128 and 128 % F == 0 and L % (128 // F) == 0:
        k = 128 // F
    kF = k * F
    Lr = L // k
    xr = x if k == 1 else x.reshape(Lr, kF)        # row-major view of same data

    # Segment boundary tables, padded to a multiple of 8 rows so the one-hot
    # matmul has a healthy contraction dim; padded rows select nothing.
    Bp = max(8, -(-B // 8) * 8)
    starts_np = np.zeros((1, Bp), np.int32)
    ends_np = np.zeros((1, Bp), np.int32)
    off = 0
    for b, n in enumerate(lengths):
        starts_np[0, b] = off
        ends_np[0, b] = off + n
        off += n
    starts = jnp.asarray(starts_np)
    ends = jnp.asarray(ends_np)
    noise_p = noise if Bp == B else jnp.pad(noise, ((0, Bp - B), (0, 0)))

    itemsize = np.dtype(x.dtype).itemsize
    q = 8 * max(1, 4 // itemsize)                  # sublane quantum: 8/16/32
    row_bytes = kF * itemsize

    # Tile rows from the bytes-per-step target.
    TL = max(q, (max(int(block_bytes), q * row_bytes) // row_bytes) // q * q)
    if TL >= Lr:
        TL = Lr                                    # single full-extent tile
    else:
        # keep >= ~8 tiles so both v7x TensorCores + double buffering stay fed
        if -(-Lr // TL) < 8 and Lr >= 8 * q:
            TL = max(q, ((-(-Lr // 8)) // q) * q)
    n_tiles = -(-Lr // TL)

    # Double-buffered in/out tiles + resident noise/boundary tables.
    vmem_needed = (2 * 2 * TL * row_bytes
                   + 2 * Bp * F * itemsize
                   + 4 * 2 * Bp * 4)
    vmem_limit = int(min(48 << 20,                 # v7x has 64 MiB/TC of VMEM
                         max(16 << 20, vmem_needed * 5 // 4 + (2 << 20))))

    cost = pl.CostEstimate(
        flops=Lr * kF + 2 * Lr * Bp * F,
        transcendentals=0,
        bytes_accessed=2 * Lr * row_bytes + Bp * F * itemsize + 4 * Bp * 4,
    )

    out = pl.pallas_call(
        _feature_dropout_kernel,
        out_shape=jax.ShapeDtypeStruct((Lr, kF), x.dtype),
        grid=(n_tiles,),
        in_specs=[
            pl.BlockSpec((TL, kF), lambda i: (i, 0)),   # x rows (tiled)
            pl.BlockSpec((Bp, F), lambda i: (0, 0)),    # noise table (resident)
            pl.BlockSpec((1, Bp), lambda i: (0, 0)),    # segment starts
            pl.BlockSpec((1, Bp), lambda i: (0, 0)),    # segment ends
        ],
        out_specs=pl.BlockSpec((TL, kF), lambda i: (i, 0)),
        compiler_params=pltpu.CompilerParams(
            dimension_semantics=("parallel",),
            vmem_limit_bytes=vmem_limit,
        ),
        cost_estimate=cost,
    )(xr, noise_p, starts, ends)

    return out if k == 1 else out.reshape(L, F)

# TODO(synk): backward (grad * noise) would reuse this same kernel via
# jax.custom_vjp; PyTorch's in-place variant has no JAX equivalent.


if __name__ == "__main__":
    key = jax.random.PRNGKey(0)
    k_x, k_noise, k_x2, k_noise2 = jax.random.split(key, 4)

    # Example 1: 3 batch elements of uneven length, hidden = 128 (lane dense).
    lengths = [300, 128, 45]
    B, F, p = len(lengths), 128, 0.5
    L = sum(lengths)
    x = jax.random.normal(k_x, (L, F), dtype=jnp.float32)
    batch_idxs = jnp.concatenate(
        [jnp.full((n,), b, dtype=jnp.int32) for b, n in enumerate(lengths)])
    noise = make_noise(k_noise, B, F, p)

    out = jax.block_until_ready(
        feature_dropout(x, lengths, noise, p=p, train=True))
    ref = x * noise[batch_idxs, :]
    assert out.shape == x.shape and out.dtype == x.dtype
    assert jnp.allclose(out, ref, atol=1e-6, rtol=1e-6), "mismatch vs reference"

    # Eval / p=0 path: identity (clone) of the input.
    out_eval = jax.block_until_ready(
        feature_dropout(x, lengths, noise, p=p, train=False))
    assert jnp.array_equal(out_eval, x)

    # Example 2: small hidden (F=64) exercising the lane-fold path.
    lengths2 = [8, 16]
    F2 = 64
    L2 = sum(lengths2)
    x2 = jax.random.normal(k_x2, (L2, F2), dtype=jnp.float32)
    bidx2 = jnp.concatenate(
        [jnp.full((n,), b, dtype=jnp.int32) for b, n in enumerate(lengths2)])
    noise2 = make_noise(k_noise2, len(lengths2), F2, p)
    out2 = jax.block_until_ready(
        feature_dropout(x2, lengths2, noise2, p=p, train=True))
    assert jnp.allclose(out2, x2 * noise2[bidx2, :], atol=1e-6, rtol=1e-6)

    print("KERNEL_OK")
</pallas_src>

<mosaic_0001>
module attributes {stable_mosaic.version = 11 : i64} {
  func.func @_feature_dropout_kernel(%arg0: i32, %arg1: memref<473x128xf32, #tpu.memory_space<vmem>>, %arg2: memref<8x128xf32, #tpu.memory_space<vmem>>, %arg3: memref<1x8xi32, #tpu.memory_space<vmem>>, %arg4: memref<1x8xi32, #tpu.memory_space<vmem>>, %arg5: memref<473x128xf32, #tpu.memory_space<vmem>>) attributes {dimension_semantics = [#tpu.dimension_semantics<parallel>], iteration_bounds = array<i64: 1>, scalar_prefetch = 0 : i64, scratch_operands = 0 : i64, tpu.core_type = #tpu.core_type<tc>, window_params = [{transform_indices = @transform_0, window_bounds = array<i64: 473, 128>}, {pipeline_mode = #tpu.pipeline_mode<synchronous>, transform_indices = @transform_1, window_bounds = array<i64: 8, 128>}, {pipeline_mode = #tpu.pipeline_mode<synchronous>, transform_indices = @transform_2, window_bounds = array<i64: 1, 8>}, {pipeline_mode = #tpu.pipeline_mode<synchronous>, transform_indices = @transform_3, window_bounds = array<i64: 1, 8>}, {transform_indices = @transform_4, window_bounds = array<i64: 473, 128>}]} {
    %c0 = arith.constant 0 : index
    %c0_0 = arith.constant 0 : index
    %0 = vector.load %arg1[%c0, %c0_0] : memref<473x128xf32, #tpu.memory_space<vmem>>, vector<473x128xf32>
    %c0_1 = arith.constant 0 : index
    %c0_2 = arith.constant 0 : index
    %1 = vector.load %arg2[%c0_1, %c0_2] : memref<8x128xf32, #tpu.memory_space<vmem>>, vector<8x128xf32>
    %c0_3 = arith.constant 0 : index
    %c0_4 = arith.constant 0 : index
    %2 = vector.load %arg3[%c0_3, %c0_4] : memref<1x8xi32, #tpu.memory_space<vmem>>, vector<1x8xi32>
    %c0_5 = arith.constant 0 : index
    %c0_6 = arith.constant 0 : index
    %3 = vector.load %arg4[%c0_5, %c0_6] : memref<1x8xi32, #tpu.memory_space<vmem>>, vector<1x8xi32>
    %c473_i32 = arith.constant 473 : i32
    %4 = arith.muli %arg0, %c473_i32 : i32
    %5 = tpu.iota {dimensions = array<i32: 0>} : vector<473x8xi32>
    %c1_i32 = arith.constant 1 : i32
    %6 = vector.broadcast %c1_i32 : i32 to vector<473x8xi32>
    %7 = arith.muli %5, %6 : vector<473x8xi32>
    %c0_i32 = arith.constant 0 : i32
    %8 = arith.addi %4, %c0_i32 : i32
    %9 = vector.broadcast %8 : i32 to vector<473x8xi32>
    %10 = arith.addi %7, %9 : vector<473x8xi32>
    %11 = vector.broadcast %2 : vector<1x8xi32> to vector<473x8xi32>
    %12 = arith.cmpi sge, %10, %11 : vector<473x8xi32>
    %13 = vector.broadcast %3 : vector<1x8xi32> to vector<473x8xi32>
    %14 = arith.cmpi slt, %10, %13 : vector<473x8xi32>
    %15 = arith.andi %12, %14 : vector<473x8xi1>
    %16 = arith.extui %15 : vector<473x8xi1> to vector<473x8xi32>
    %17 = arith.sitofp %16 : vector<473x8xi32> to vector<473x8xf32>
    %cst = arith.constant dense<0.000000e+00> : vector<473x128xf32>
    %18 = tpu.matmul %17, %1, %cst {dimension_numbers = #tpu.dot_dimension_numbers<[1], [0], [0], [1], [0, 0, 1, 1], [], []>} : vector<473x8xf32>, vector<8x128xf32>, vector<473x128xf32> -> vector<473x128xf32>
    %19 = arith.mulf %0, %18 : vector<473x128xf32>
    %c0_7 = arith.constant 0 : index
    %c0_8 = arith.constant 0 : index
    %20 = vector.load %arg5[%c0_7, %c0_8] : memref<473x128xf32, #tpu.memory_space<vmem>>, vector<473x128xf32>
    tpu.vector_store %arg5[%c0_7, %c0_8], %19 {strides = array<i32>} : memref<473x128xf32, #tpu.memory_space<vmem>>, vector<473x128xf32>,
    return
  }
  func.func @transform_0(%arg0: i32) -> (i32, i32) {
    %c0_i32 = arith.constant 0 : i32
    %c0_i32_0 = arith.constant 0 : i32
    return %arg0, %c0_i32 : i32, i32
  }
  func.func @transform_1(%arg0: i32) -> (i32, i32) {
    %c0_i32 = arith.constant 0 : i32
    %c0_i32_0 = arith.constant 0 : i32
    %c0_i32_1 = arith.constant 0 : i32
    return %c0_i32, %c0_i32_0 : i32, i32
  }
  func.func @transform_2(%arg0: i32) -> (i32, i32) {
    %c0_i32 = arith.constant 0 : i32
    %c0_i32_0 = arith.constant 0 : i32
    %c0_i32_1 = arith.constant 0 : i32
    return %c0_i32, %c0_i32_0 : i32, i32
  }
  func.func @transform_3(%arg0: i32) -> (i32, i32) {
    %c0_i32 = arith.constant 0 : i32
    %c0_i32_0 = arith.constant 0 : i32
    %c0_i32_1 = arith.constant 0 : i32
    return %c0_i32, %c0_i32_0 : i32, i32
  }
  func.func @transform_4(%arg0: i32) -> (i32, i32) {
    %c0_i32 = arith.constant 0 : i32
    %c0_i32_0 = arith.constant 0 : i32
    return %arg0, %c0_i32 : i32, i32
  }
}

</mosaic_0001>

<bundles_post_ra>
// kernel: tpu_custom_call.1
= control target key start
LH: loop header
LB: loop body
LE: loop exit
PB: predicated region body
PF: predicated region fallthrough
CT: control target
= control target key end

     0   :  { %9 = vsyncpa [#allocation3], 0  ;;  %s2134_s0 = inlined_call_operand.hbm [shape: f32[473,128], index: 0, kind: input, shape index: {}]   ;;  %s2135_s1 = inlined_call_operand.hbm [shape: f32[8,128], index: 1, kind: input, shape index: {}]   ;;  %s2136_s2 = inlined_call_operand.vmem [shape: s32[1,8], index: 2, kind: input, shape index: {}]   ;;  %s2137_s3 = inlined_call_operand.vmem [shape: s32[1,8], index: 3, kind: input, shape index: {}]   ;;  %s2138_s4 = inlined_call_operand.hbm [shape: f32[473,128], index: 4, kind: output, shape index: {}]  }
   0x1   :  { %10 = vsyncpa [#allocation6], 0 }
   0x2   :  { %11 = vsyncpa [#allocation4], 0  ;;  %s1571_s15 = smov [#allocation2]  }
   0x3   :  { %s17_s16 = sshll.u32 %s1571_s15, 4  ;;  %s18_s16 = int_to_ptr.vmem [resolvable:$true] %s17_s16 }
   0x4   :  { %s1513_s17 = scalar_lea.vmem %s18_s16, 7680  ;;  %p1518_p1 = scmp.lt.s32.totalorder %s18_s16, %s18_s16 }
   0x5   :  { %p1514_p0 = scmp.ne.s32.totalorder %s18_s16, %s1513_s17  ;;  %p1519_p2 = scmp.lt.s32.totalorder %s1513_s17, %s1513_s17 }
   0x7   :  { %p1520_p3 = por %p1519_p2, %p1518_p1 }
   0x9   :  { %p1521_p4 = pnand %p1520_p3, %p1514_p0 }
   0xb   :  { %1524 = shalt.err (!%p1521_p4)
}
   0xc   :  { %s1572_s18 = smov 128   ;;  %s1573_s19 = smov 8  }
   0xd   :  { %23 = dma.hbm_to_vmem [thread:$0]  %s2134_s0, 7680, %s18_s16, [#allocation3], %s1572_s18, %s1572_s18, %s1573_s19  }
   0xe   :  { %s1574_s22 = smov [#allocation5]  }
   0xf   :  { %s30_s23 = sshll.u32 %s1574_s22, 4  ;;  %s31_s23 = int_to_ptr.vmem [resolvable:$true] %s30_s23 }
  0x10   :  { %s1533_s24 = scalar_lea.vmem %s31_s23, 128  ;;  %p1538_p6 = scmp.lt.s32.totalorder %s31_s23, %s31_s23 }
  0x11   :  { %p1534_p5 = scmp.ne.s32.totalorder %s31_s23, %s1533_s24  ;;  %p1539_p7 = scmp.lt.s32.totalorder %s1533_s24, %s1533_s24 }
  0x13   :  { %p1540_p8 = por %p1539_p7, %p1538_p6 }
  0x15   :  { %p1541_p9 = pnand %p1540_p8, %p1534_p5 }
  0x17   :  { %1544 = shalt.err (!%p1541_p9)
}
  0x18   :  { %33 = dma.hbm_to_vmem [thread:$0]  %s2135_s1, 128, %s31_s23, [#allocation6]  }
  0x19   :  { %1565 = dma.done.wait [#allocation3], 7680  }
  0x1a   :  { %1566 = vsyncadd [#allocation3], 4294959616 }
  0x1b   :  { %1567 = dma.done.wait [#allocation6], 128  }
  0x1c   :  { %1568 = vsyncadd [#allocation6], 4294967168  ;;  %v108_v0 = vlaneseq  ;;  %vm538_vm0 = vcmask 64512   ;;  %v104_v8 = vld [vmem:[#allocation5] sm:$0xff]  ;;  %v1575_v14 = vmov 0.0  }
  0x1d   :  { %v1622_v9 = vld [vmem:[%s2136_s2] ss:$0 sm:$0xff]  ;;  %1405 = vmatprep.subr.mxu0 %v104_v8  ;;  %1497 = vmatprep.subr.mxu1 %v104_v8  ;;  %s1576_s2 = smov [#allocation7]  }
  0x1e   :  { %v1611_v1 = vshrl.u32 %v108_v0, 7  ;;  %v1627_v10 = vld [vmem:[%s2137_s3] ss:$0 sm:$0xff]  ;;  %1406 = vmatpush3.msra.mxu0 %v104_v8  ;;  %1498 = vmatpush3.msra.mxu1 %v104_v8  ;;  %s1209_s3 = sshll.u32 %s1576_s2, 4  ;;  %s1210_s3 = int_to_ptr.vmem [resolvable:$true] %s1209_s3 }
  0x1f   :  { %s1545_s29 = scalar_lea.vmem %s1210_s3, 7680  ;;  %p1550_p11 = scmp.lt.s32.totalorder %s1210_s3, %s1210_s3 }
  0x20   :  { %v139_v2 = vadd.s32 240, %v1611_v1  ;;  %v110_v3 = vadd.s32 8, %v1611_v1  ;;  %v140_v4 = vadd.s32 248, %v1611_v1  ;;  %v111_v5 = vadd.s32 16, %v1611_v1  ;;  %p1546_p10 = scmp.ne.s32.totalorder %s1210_s3, %s1545_s29  ;;  %p1551_p12 = scmp.lt.s32.totalorder %s1545_s29, %s1545_s29 }
  0x21   :  { %v141_v6 = vadd.s32 256, %v1611_v1  ;;  %v112_v7 = vadd.s32 24, %v1611_v1  ;;  %v142_v11 = vadd.s32 264, %v1611_v1  ;;  %vm234_vm1 = vcmp.ge.s32.totalorder %v1611_v1, %v1622_v9 }
  0x22   :  { %vm298_vm2 = vcmp.lt.s32.totalorder %v1611_v1, %v1627_v10  ;;  %vm264_vm3 = vcmp.ge.s32.totalorder %v139_v2, %v1622_v9  ;;  %v113_v12 = vadd.s32 32, %v1611_v1  ;;  %vm328_vm5 = vcmp.lt.s32.totalorder %v139_v2, %v1627_v10  ;;  %p1552_p13 = por %p1551_p12, %p1550_p11 }
  0x23   :  { %vm358_vm4 = vmand %vm234_vm1, %vm298_vm2  ;;  %vm235_vm6 = vcmp.ge.s32.totalorder %v110_v3, %v1622_v9  ;;  %vm299_vm7 = vcmp.lt.s32.totalorder %v110_v3, %v1627_v10  ;;  %v143_v13 = vadd.s32 272, %v1611_v1  ;;  %vm265_vm9 = vcmp.ge.s32.totalorder %v140_v4, %v1622_v9 }
  0x24   :  { %v1224_v15 = vsel %vm358_vm4, 1.0, %v1575_v14  ;;  %vm388_vm8 = vmand %vm264_vm3, %vm328_vm5  ;;  %vm329_vm10 = vcmp.lt.s32.totalorder %v140_v4, %v1627_v10  ;;  %vm236_vm11 = vcmp.ge.s32.totalorder %v111_v5, %v1622_v9  ;;  %vm300_vm13 = vcmp.lt.s32.totalorder %v111_v5, %v1627_v10  ;;  %p1553_p0 = pnand %p1552_p13, %p1546_p10 }
  0x25   :  { %1407 = vmatprep.mubr.msk.f32.mxu0 %vm538_vm0, %v1224_v15  ;;  %v1254_v16 = vsel %vm388_vm8, 1.0, %v1575_v14  ;;  %vm359_vm12 = vmand %vm235_vm6, %vm299_vm7  ;;  %vm266_vm14 = vcmp.ge.s32.totalorder %v141_v6, %v1622_v9  ;;  %vm330_vm15 = vcmp.lt.s32.totalorder %v141_v6, %v1627_v10  ;;  %vm237_vm2 = vcmp.ge.s32.totalorder %v112_v7, %v1622_v9 }
  0x26   :  { %1452 = vmatprep.mubr.msk.f32.mxu1 %vm538_vm0, %v1254_v16  ;;  %v1225_v17 = vsel %vm359_vm12, 1.0, %v1575_v14  ;;  %vm389_vm1 = vmand %vm265_vm9, %vm329_vm10  ;;  %vm301_vm3 = vcmp.lt.s32.totalorder %v112_v7, %v1627_v10  ;;  %v114_v18 = vadd.s32 40, %v1611_v1  ;;  %vm267_vm5 = vcmp.ge.s32.totalorder %v142_v11, %v1622_v9 }
  0x27   :  { %1408 = vmatmul.mubr.msk.f32.vlgmr.msra.gmra.mxu0 %vm538_vm0, %v1225_v17  ;;  %v1255_v19 = vsel %vm389_vm1, 1.0, %v1575_v14  ;;  %vm360_vm4 = vmand %vm236_vm11, %vm300_vm13  ;;  %vm331_vm6 = vcmp.lt.s32.totalorder %v142_v11, %v1627_v10  ;;  %v144_v20 = vadd.s32 280, %v1611_v1  ;;  %vm238_vm8 = vcmp.ge.s32.totalorder %v113_v12, %v1622_v9 }
  0x28   :  { %1453 = vmatmul.mubr.msk.f32.vlgmr.msra.gmra.mxu1 %vm538_vm0, %v1255_v19  ;;  %v1226_v21 = vsel %vm360_vm4, 1.0, %v1575_v14  ;;  %vm390_vm7 = vmand %vm266_vm14, %vm330_vm15  ;;  %vm302_vm9 = vcmp.lt.s32.totalorder %v113_v12, %v1627_v10  ;;  %v115_v22 = vadd.s32 48, %v1611_v1  ;;  %vm268_vm11 = vcmp.ge.s32.totalorder %v143_v13, %v1622_v9 }
  0x29   :  { %1410 = vmatprep.mubr.msk.f32.mxu0 %vm538_vm0, %v1226_v21  ;;  %v1256_v23 = vsel %vm390_vm7, 1.0, %v1575_v14  ;;  %vm361_vm10 = vmand %vm237_vm2, %vm301_vm3  ;;  %vm332_vm12 = vcmp.lt.s32.totalorder %v143_v13, %v1627_v10  ;;  %v145_v24 = vadd.s32 288, %v1611_v1  ;;  %vm239_vm14 = vcmp.ge.s32.totalorder %v114_v18, %v1622_v9 }
  0x2a   :  { %1455 = vmatprep.mubr.msk.f32.mxu1 %vm538_vm0, %v1256_v23  ;;  %v1227_v25 = vsel %vm361_vm10, 1.0, %v1575_v14  ;;  %vm391_vm13 = vmand %vm267_vm5, %vm331_vm6  ;;  %vm303_vm15 = vcmp.lt.s32.totalorder %v114_v18, %v1627_v10  ;;  %v116_v26 = vadd.s32 56, %v1611_v1  ;;  %vm269_vm2 = vcmp.ge.s32.totalorder %v144_v20, %v1622_v9 }
  0x2b   :  { %1411 = vmatmul.mubr.msk.f32.gmra.mxu0 %vm538_vm0, %v1227_v25  ;;  %v1257_v27 = vsel %vm391_vm13, 1.0, %v1575_v14  ;;  %vm362_vm1 = vmand %vm238_vm8, %vm302_vm9  ;;  %vm333_vm3 = vcmp.lt.s32.totalorder %v144_v20, %v1627_v10  ;;  %v146_v28 = vadd.s32 296, %v1611_v1  ;;  %vm240_vm5 = vcmp.ge.s32.totalorder %v115_v22, %v1622_v9 }
  0x2c   :  { %1456 = vmatmul.mubr.msk.f32.gmra.mxu1 %vm538_vm0, %v1257_v27  ;;  %v1228_v29 = vsel %vm362_vm1, 1.0, %v1575_v14  ;;  %vm392_vm4 = vmand %vm268_vm11, %vm332_vm12  ;;  %vm304_vm6 = vcmp.lt.s32.totalorder %v115_v22, %v1627_v10  ;;  %v117_v30 = vadd.s32 64, %v1611_v1  ;;  %vm270_vm8 = vcmp.ge.s32.totalorder %v145_v24, %v1622_v9 }
  0x2d   :  { %1413 = vmatprep.mubr.msk.f32.mxu0 %vm538_vm0, %v1228_v29  ;;  %v1258_v31 = vsel %vm392_vm4, 1.0, %v1575_v14  ;;  %vm363_vm7 = vmand %vm239_vm14, %vm303_vm15  ;;  %vm334_vm9 = vcmp.lt.s32.totalorder %v145_v24, %v1627_v10  ;;  %v147_v32 = vadd.s32 304, %v1611_v1  ;;  %vm241_vm11 = vcmp.ge.s32.totalorder %v116_v26, %v1622_v9 }
  0x2e   :  { %1458 = vmatprep.mubr.msk.f32.mxu1 %vm538_vm0, %v1258_v31  ;;  %v1229_v33 = vsel %vm363_vm7, 1.0, %v1575_v14  ;;  %vm393_vm10 = vmand %vm269_vm2, %vm333_vm3  ;;  %vm305_vm12 = vcmp.lt.s32.totalorder %v116_v26, %v1627_v10  ;;  %v118_v34 = vadd.s32 72, %v1611_v1  ;;  %vm271_vm14 = vcmp.ge.s32.totalorder %v146_v28, %v1622_v9 }
  0x2f   :  { %1414 = vmatmul.mubr.msk.f32.gmra.mxu0 %vm538_vm0, %v1229_v33  ;;  %v1259_v35 = vsel %vm393_vm10, 1.0, %v1575_v14  ;;  %vm364_vm13 = vmand %vm240_vm5, %vm304_vm6  ;;  %vm335_vm15 = vcmp.lt.s32.totalorder %v146_v28, %v1627_v10  ;;  %v148_v36 = vadd.s32 312, %v1611_v1  ;;  %vm242_vm2 = vcmp.ge.s32.totalorder %v117_v30, %v1622_v9 }
  0x30   :  { %1459 = vmatmul.mubr.msk.f32.gmra.mxu1 %vm538_vm0, %v1259_v35  ;;  %v1230_v37 = vsel %vm364_vm13, 1.0, %v1575_v14  ;;  %vm394_vm1 = vmand %vm270_vm8, %vm334_vm9  ;;  %vm306_vm3 = vcmp.lt.s32.totalorder %v117_v30, %v1627_v10  ;;  %v119_v38 = vadd.s32 80, %v1611_v1  ;;  %vm272_vm5 = vcmp.ge.s32.totalorder %v147_v32, %v1622_v9 }
  0x31   :  { %1416 = vmatprep.mubr.msk.f32.mxu0 %vm538_vm0, %v1230_v37  ;;  %v1260_v39 = vsel %vm394_vm1, 1.0, %v1575_v14  ;;  %vm365_vm4 = vmand %vm241_vm11, %vm305_vm12  ;;  %vm336_vm6 = vcmp.lt.s32.totalorder %v147_v32, %v1627_v10  ;;  %v149_v40 = vadd.s32 320, %v1611_v1  ;;  %vm243_vm8 = vcmp.ge.s32.totalorder %v118_v34, %v1622_v9 }
  0x32   :  { %1461 = vmatprep.mubr.msk.f32.mxu1 %vm538_vm0, %v1260_v39  ;;  %v1231_v41 = vsel %vm365_vm4, 1.0, %v1575_v14  ;;  %vm395_vm7 = vmand %vm271_vm14, %vm335_vm15  ;;  %vm307_vm9 = vcmp.lt.s32.totalorder %v118_v34, %v1627_v10  ;;  %v120_v42 = vadd.s32 88, %v1611_v1  ;;  %vm273_vm11 = vcmp.ge.s32.totalorder %v148_v36, %v1622_v9 }
  0x33   :  { %1417 = vmatmul.mubr.msk.f32.gmra.mxu0 %vm538_vm0, %v1231_v41  ;;  %v1261_v43 = vsel %vm395_vm7, 1.0, %v1575_v14  ;;  %vm366_vm10 = vmand %vm242_vm2, %vm306_vm3  ;;  %vm337_vm12 = vcmp.lt.s32.totalorder %v148_v36, %v1627_v10  ;;  %v150_v44 = vadd.s32 328, %v1611_v1  ;;  %vm244_vm14 = vcmp.ge.s32.totalorder %v119_v38, %v1622_v9 }
  0x34   :  { %1462 = vmatmul.mubr.msk.f32.gmra.mxu1 %vm538_vm0, %v1261_v43  ;;  %v1232_v45 = vsel %vm366_vm10, 1.0, %v1575_v14  ;;  %vm396_vm13 = vmand %vm272_vm5, %vm336_vm6  ;;  %vm308_vm15 = vcmp.lt.s32.totalorder %v119_v38, %v1627_v10  ;;  %v121_v46 = vadd.s32 96, %v1611_v1  ;;  %vm274_vm2 = vcmp.ge.s32.totalorder %v149_v40, %v1622_v9 }
  0x35   :  { %1419 = vmatprep.mubr.msk.f32.mxu0 %vm538_vm0, %v1232_v45  ;;  %v1262_v47 = vsel %vm396_vm13, 1.0, %v1575_v14  ;;  %vm367_vm1 = vmand %vm243_vm8, %vm307_vm9  ;;  %vm338_vm3 = vcmp.lt.s32.totalorder %v149_v40, %v1627_v10  ;;  %v151_v48 = vadd.s32 336, %v1611_v1  ;;  %vm245_vm5 = vcmp.ge.s32.totalorder %v120_v42, %v1622_v9 }
  0x36   :  { %1464 = vmatprep.mubr.msk.f32.mxu1 %vm538_vm0, %v1262_v47  ;;  %v1233_v49 = vsel %vm367_vm1, 1.0, %v1575_v14  ;;  %vm397_vm4 = vmand %vm273_vm11, %vm337_vm12  ;;  %vm309_vm6 = vcmp.lt.s32.totalorder %v120_v42, %v1627_v10  ;;  %v122_v50 = vadd.s32 104, %v1611_v1  ;;  %vm275_vm8 = vcmp.ge.s32.totalorder %v150_v44, %v1622_v9 }
  0x37   :  { %1420 = vmatmul.mubr.msk.f32.gmra.mxu0 %vm538_vm0, %v1233_v49  ;;  %v1263_v51 = vsel %vm397_vm4, 1.0, %v1575_v14  ;;  %vm368_vm7 = vmand %vm244_vm14, %vm308_vm15  ;;  %vm339_vm9 = vcmp.lt.s32.totalorder %v150_v44, %v1627_v10  ;;  %v152_v52 = vadd.s32 344, %v1611_v1  ;;  %vm246_vm11 = vcmp.ge.s32.totalorder %v121_v46, %v1622_v9 }
  0x38   :  { %1465 = vmatmul.mubr.msk.f32.gmra.mxu1 %vm538_vm0, %v1263_v51  ;;  %v1234_v53 = vsel %vm368_vm7, 1.0, %v1575_v14  ;;  %vm398_vm10 = vmand %vm274_vm2, %vm338_vm3  ;;  %vm310_vm12 = vcmp.lt.s32.totalorder %v121_v46, %v1627_v10  ;;  %v123_v54 = vadd.s32 112, %v1611_v1  ;;  %vm276_vm14 = vcmp.ge.s32.totalorder %v151_v48, %v1622_v9 }
  0x39   :  { %1422 = vmatprep.mubr.msk.f32.mxu0 %vm538_vm0, %v1234_v53  ;;  %v1264_v55 = vsel %vm398_vm10, 1.0, %v1575_v14  ;;  %vm369_vm13 = vmand %vm245_vm5, %vm309_vm6  ;;  %vm340_vm15 = vcmp.lt.s32.totalorder %v151_v48, %v1627_v10  ;;  %v153_v56 = vadd.s32 352, %v1611_v1  ;;  %vm247_vm2 = vcmp.ge.s32.totalorder %v122_v50, %v1622_v9 }
  0x3a   :  { %1467 = vmatprep.mubr.msk.f32.mxu1 %vm538_vm0, %v1264_v55  ;;  %v1235_v57 = vsel %vm369_vm13, 1.0, %v1575_v14  ;;  %vm399_vm1 = vmand %vm275_vm8, %vm339_vm9  ;;  %vm311_vm3 = vcmp.lt.s32.totalorder %v122_v50, %v1627_v10  ;;  %v124_v58 = vadd.s32 120, %v1611_v1  ;;  %vm277_vm5 = vcmp.ge.s32.totalorder %v152_v52, %v1622_v9 }
  0x3b   :  { %1423 = vmatmul.mubr.msk.f32.gmra.mxu0 %vm538_vm0, %v1235_v57  ;;  %v1265_v59 = vsel %vm399_vm1, 1.0, %v1575_v14  ;;  %vm370_vm4 = vmand %vm246_vm11, %vm310_vm12  ;;  %vm341_vm6 = vcmp.lt.s32.totalorder %v152_v52, %v1627_v10  ;;  %v154_v60 = vadd.s32 360, %v1611_v1  ;;  %vm248_vm8 = vcmp.ge.s32.totalorder %v123_v54, %v1622_v9 }
  0x3c   :  { %1468 = vmatmul.mubr.msk.f32.gmra.mxu1 %vm538_vm0, %v1265_v59  ;;  %v1236_v61 = vsel %vm370_vm4, 1.0, %v1575_v14  ;;  %vm400_vm7 = vmand %vm276_vm14, %vm340_vm15  ;;  %vm312_vm9 = vcmp.lt.s32.totalorder %v123_v54, %v1627_v10  ;;  %v125_v62 = vadd.s32 128, %v1611_v1  ;;  %vm278_vm11 = vcmp.ge.s32.totalorder %v153_v56, %v1622_v9 }
  0x3d   :  { %1425 = vmatprep.mubr.msk.f32.mxu0 %vm538_vm0, %v1236_v61  ;;  %v1266_v63 = vsel %vm400_vm7, 1.0, %v1575_v14  ;;  %vm371_vm10 = vmand %vm247_vm2, %vm311_vm3  ;;  %vm342_vm12 = vcmp.lt.s32.totalorder %v153_v56, %v1627_v10  ;;  %v155_v0 = vadd.s32 368, %v1611_v1  ;;  %vm249_vm14 = vcmp.ge.s32.totalorder %v124_v58, %v1622_v9 }
  0x3e   :  { %1470 = vmatprep.mubr.msk.f32.mxu1 %vm538_vm0, %v1266_v63  ;;  %v1237_v2 = vsel %vm371_vm10, 1.0, %v1575_v14  ;;  %vm401_vm13 = vmand %vm277_vm5, %vm341_vm6  ;;  %vm313_vm15 = vcmp.lt.s32.totalorder %v124_v58, %v1627_v10  ;;  %v126_v3 = vadd.s32 136, %v1611_v1  ;;  %vm279_vm2 = vcmp.ge.s32.totalorder %v154_v60, %v1622_v9  ;;  %v75_v63 = vld [vmem:[#allocation2 + $0xf8] sm:$0xff] }
  0x3f   :  { %1426 = vmatmul.mubr.msk.f32.gmra.mxu0 %vm538_vm0, %v1237_v2  ;;  %v1267_v4 = vsel %vm401_vm13, 1.0, %v1575_v14  ;;  %vm372_vm1 = vmand %vm248_vm8, %vm312_vm9  ;;  %vm343_vm3 = vcmp.lt.s32.totalorder %v154_v60, %v1627_v10  ;;  %v156_v5 = vadd.s32 376, %v1611_v1  ;;  %vm250_vm5 = vcmp.ge.s32.totalorder %v125_v62, %v1622_v9  ;;  %v44_v2 = vld [vmem:[#allocation2] sm:$0xff] }
  0x40   :  { %1471 = vmatmul.mubr.msk.f32.gmra.mxu1 %vm538_vm0, %v1267_v4  ;;  %v1238_v6 = vsel %vm372_vm1, 1.0, %v1575_v14  ;;  %vm402_vm4 = vmand %vm278_vm11, %vm342_vm12  ;;  %vm314_vm6 = vcmp.lt.s32.totalorder %v125_v62, %v1627_v10  ;;  %v127_v7 = vadd.s32 144, %v1611_v1  ;;  %vm280_vm8 = vcmp.ge.s32.totalorder %v155_v0, %v1622_v9 }
  0x41   :  { %1428 = vmatprep.mubr.msk.f32.mxu0 %vm538_vm0, %v1238_v6  ;;  %v1268_v8 = vsel %vm402_vm4, 1.0, %v1575_v14  ;;  %vm373_vm7 = vmand %vm249_vm14, %vm313_vm15  ;;  %vm344_vm9 = vcmp.lt.s32.totalorder %v155_v0, %v1627_v10  ;;  %v157_v11 = vadd.s32 384, %v1611_v1  ;;  %vm251_vm11 = vcmp.ge.s32.totalorder %v126_v3, %v1622_v9 }
  0x42   :  { %1473 = vmatprep.mubr.msk.f32.mxu1 %vm538_vm0, %v1268_v8  ;;  %v1239_v12 = vsel %vm373_vm7, 1.0, %v1575_v14  ;;  %vm403_vm10 = vmand %vm279_vm2, %vm343_vm3  ;;  %vm315_vm12 = vcmp.lt.s32.totalorder %v126_v3, %v1627_v10  ;;  %v128_v13 = vadd.s32 152, %v1611_v1  ;;  %vm281_vm14 = vcmp.ge.s32.totalorder %v156_v5, %v1622_v9  ;;  %v47_v8 = vld [vmem:[#allocation2 + $0x18] sm:$0xff] }
  0x43   :  { %1429 = vmatmul.mubr.msk.f32.gmra.mxu0 %vm538_vm0, %v1239_v12  ;;  %v1269_v15 = vsel %vm403_vm10, 1.0, %v1575_v14  ;;  %vm374_vm13 = vmand %vm250_vm5, %vm314_vm6  ;;  %vm345_vm15 = vcmp.lt.s32.totalorder %v156_v5, %v1627_v10  ;;  %v158_v16 = vadd.s32 392, %v1611_v1  ;;  %vm252_vm2 = vcmp.ge.s32.totalorder %v127_v7, %v1622_v9  ;;  %v74_v5 = vld [vmem:[#allocation2 + $0xf0] sm:$0xff] }
  0x44   :  { %1474 = vmatmul.mubr.msk.f32.gmra.mxu1 %vm538_vm0, %v1269_v15  ;;  %v1240_v17 = vsel %vm374_vm13, 1.0, %v1575_v14  ;;  %vm404_vm1 = vmand %vm280_vm8, %vm344_vm9  ;;  %vm316_vm3 = vcmp.lt.s32.totalorder %v127_v7, %v1627_v10  ;;  %v129_v18 = vadd.s32 160, %v1611_v1  ;;  %vm282_vm5 = vcmp.ge.s32.totalorder %v157_v11, %v1622_v9 }
  0x45   :  { %1431 = vmatprep.mubr.msk.f32.mxu0 %vm538_vm0, %v1240_v17  ;;  %v1270_v19 = vsel %vm404_vm1, 1.0, %v1575_v14  ;;  %vm375_vm4 = vmand %vm251_vm11, %vm315_vm12  ;;  %vm346_vm6 = vcmp.lt.s32.totalorder %v157_v11, %v1627_v10  ;;  %v159_v20 = vadd.s32 400, %v1611_v1  ;;  %vm253_vm8 = vcmp.ge.s32.totalorder %v128_v13, %v1622_v9 }
  0x46   :  { %1476 = vmatprep.mubr.msk.f32.mxu1 %vm538_vm0, %v1270_v19  ;;  %v1241_v21 = vsel %vm375_vm4, 1.0, %v1575_v14  ;;  %vm405_vm7 = vmand %vm281_vm14, %vm345_vm15  ;;  %vm317_vm9 = vcmp.lt.s32.totalorder %v128_v13, %v1627_v10  ;;  %v130_v22 = vadd.s32 168, %v1611_v1  ;;  %vm283_vm11 = vcmp.ge.s32.totalorder %v158_v16, %v1622_v9  ;;  %v77_v13 = vld [vmem:[#allocation2 + $0x108] sm:$0xff]  ;;  %v76_v19 = vld [vmem:[#allocation2 + $0x100] sm:$0xff] }
  0x47   :  { %1432 = vmatmul.mubr.msk.f32.gmra.mxu0 %vm538_vm0, %v1241_v21  ;;  %v1271_v23 = vsel %vm405_vm7, 1.0, %v1575_v14  ;;  %vm376_vm10 = vmand %vm252_vm2, %vm316_vm3  ;;  %vm347_vm12 = vcmp.lt.s32.totalorder %v158_v16, %v1627_v10  ;;  %v160_v24 = vadd.s32 408, %v1611_v1  ;;  %vm254_vm14 = vcmp.ge.s32.totalorder %v129_v18, %v1622_v9 }
  0x48   :  { %1477 = vmatmul.mubr.msk.f32.gmra.mxu1 %vm538_vm0, %v1271_v23  ;;  %v1242_v25 = vsel %vm376_vm10, 1.0, %v1575_v14  ;;  %vm406_vm13 = vmand %vm282_vm5, %vm346_vm6  ;;  %vm318_vm15 = vcmp.lt.s32.totalorder %v129_v18, %v1627_v10  ;;  %v131_v26 = vadd.s32 176, %v1611_v1  ;;  %vm284_vm2 = vcmp.ge.s32.totalorder %v159_v20, %v1622_v9 }
  0x49   :  { %1434 = vmatprep.mubr.msk.f32.mxu0 %vm538_vm0, %v1242_v25  ;;  %v1272_v27 = vsel %vm406_vm13, 1.0, %v1575_v14  ;;  %vm377_vm1 = vmand %vm253_vm8, %vm317_vm9  ;;  %vm348_vm3 = vcmp.lt.s32.totalorder %v159_v20, %v1627_v10  ;;  %v161_v28 = vadd.s32 416, %v1611_v1  ;;  %vm255_vm5 = vcmp.ge.s32.totalorder %v130_v22, %v1622_v9  ;;  %v79_v25 = vld [vmem:[#allocation2 + $0x118] sm:$0xff] }
  0x4a   :  { %1479 = vmatprep.mubr.msk.f32.mxu1 %vm538_vm0, %v1272_v27  ;;  %v1243_v29 = vsel %vm377_vm1, 1.0, %v1575_v14  ;;  %vm407_vm4 = vmand %vm283_vm11, %vm347_vm12  ;;  %vm319_vm6 = vcmp.lt.s32.totalorder %v130_v22, %v1627_v10  ;;  %v132_v30 = vadd.s32 184, %v1611_v1  ;;  %vm285_vm8 = vcmp.ge.s32.totalorder %v160_v24, %v1622_v9  ;;  %v49_v22 = vld [vmem:[#allocation2 + $0x28] sm:$0xff] }
  0x4b   :  { %1435 = vmatmul.mubr.msk.f32.gmra.mxu0 %vm538_vm0, %v1243_v29  ;;  %v1273_v31 = vsel %vm407_vm4, 1.0, %v1575_v14  ;;  %vm378_vm7 = vmand %vm254_vm14, %vm318_vm15  ;;  %vm349_vm9 = vcmp.lt.s32.totalorder %v160_v24, %v1627_v10  ;;  %v162_v32 = vadd.s32 424, %v1611_v1  ;;  %vm256_vm11 = vcmp.ge.s32.totalorder %v131_v26, %v1622_v9 }
  0x4c   :  { %1480 = vmatmul.mubr.msk.f32.gmra.mxu1 %vm538_vm0, %v1273_v31  ;;  %v1244_v33 = vsel %vm378_vm7, 1.0, %v1575_v14  ;;  %vm408_vm10 = vmand %vm284_vm2, %vm348_vm3  ;;  %vm320_vm12 = vcmp.lt.s32.totalorder %v131_v26, %v1627_v10  ;;  %v133_v34 = vadd.s32 192, %v1611_v1  ;;  %vm286_vm14 = vcmp.ge.s32.totalorder %v161_v28, %v1622_v9  ;;  %v78_v31 = vld [vmem:[#allocation2 + $0x110] sm:$0xff] }
  0x4d   :  { %1437 = vmatprep.mubr.msk.f32.mxu0 %vm538_vm0, %v1244_v33  ;;  %v1274_v35 = vsel %vm408_vm10, 1.0, %v1575_v14  ;;  %vm379_vm13 = vmand %vm255_vm5, %vm319_vm6  ;;  %vm350_vm15 = vcmp.lt.s32.totalorder %v161_v28, %v1627_v10  ;;  %v163_v36 = vadd.s32 432, %v1611_v1  ;;  %vm257_vm2 = vcmp.ge.s32.totalorder %v132_v30, %v1622_v9  ;;  %v48_v28 = vld [vmem:[#allocation2 + $0x20] sm:$0xff] }
  0x4e   :  { %1482 = vmatprep.mubr.msk.f32.mxu1 %vm538_vm0, %v1274_v35  ;;  %v1245_v37 = vsel %vm379_vm13, 1.0, %v1575_v14  ;;  %vm409_vm1 = vmand %vm285_vm8, %vm349_vm9  ;;  %vm321_vm3 = vcmp.lt.s32.totalorder %v132_v30, %v1627_v10  ;;  %v134_v38 = vadd.s32 200, %v1611_v1  ;;  %vm287_vm5 = vcmp.ge.s32.totalorder %v162_v32, %v1622_v9 }
  0x4f   :  { %1438 = vmatmul.mubr.msk.f32.gmra.mxu0 %vm538_vm0, %v1245_v37  ;;  %v1275_v39 = vsel %vm409_vm1, 1.0, %v1575_v14  ;;  %vm380_vm4 = vmand %vm256_vm11, %vm320_vm12  ;;  %vm351_vm6 = vcmp.lt.s32.totalorder %v162_v32, %v1627_v10  ;;  %v164_v40 = vadd.s32 440, %v1611_v1  ;;  %vm258_vm8 = vcmp.ge.s32.totalorder %v133_v34, %v1622_v9  ;;  %v81_v37 = vld [vmem:[#allocation2 + $0x128] sm:$0xff] }
  0x50   :  { %1483 = vmatmul.mubr.msk.f32.gmra.mxu1 %vm538_vm0, %v1275_v39  ;;  %v1246_v41 = vsel %vm380_vm4, 1.0, %v1575_v14  ;;  %vm410_vm7 = vmand %vm286_vm14, %vm350_vm15  ;;  %vm322_vm9 = vcmp.lt.s32.totalorder %v133_v34, %v1627_v10  ;;  %v135_v42 = vadd.s32 208, %v1611_v1  ;;  %vm288_vm11 = vcmp.ge.s32.totalorder %v163_v36, %v1622_v9  ;;  %v51_v34 = vld [vmem:[#allocation2 + $0x38] sm:$0xff] }
  0x51   :  { %1440 = vmatprep.mubr.msk.f32.mxu0 %vm538_vm0, %v1246_v41  ;;  %v1276_v43 = vsel %vm410_vm7, 1.0, %v1575_v14  ;;  %vm381_vm10 = vmand %vm257_vm2, %vm321_vm3  ;;  %vm352_vm12 = vcmp.lt.s32.totalorder %v163_v36, %v1627_v10  ;;  %v165_v44 = vadd.s32 448, %v1611_v1  ;;  %vm259_vm14 = vcmp.ge.s32.totalorder %v134_v38, %v1622_v9 }
  0x52   :  { %1485 = vmatprep.mubr.msk.f32.mxu1 %vm538_vm0, %v1276_v43  ;;  %v1247_v45 = vsel %vm381_vm10, 1.0, %v1575_v14  ;;  %vm411_vm13 = vmand %vm287_vm5, %vm351_vm6  ;;  %vm323_vm15 = vcmp.lt.s32.totalorder %v134_v38, %v1627_v10  ;;  %v136_v46 = vadd.s32 216, %v1611_v1  ;;  %vm289_vm2 = vcmp.ge.s32.totalorder %v164_v40, %v1622_v9  ;;  %v80_v43 = vld [vmem:[#allocation2 + $0x120] sm:$0xff] }
  0x53   :  { %1441 = vmatmul.mubr.msk.f32.gmra.mxu0 %vm538_vm0, %v1247_v45  ;;  %v1277_v47 = vsel %vm411_vm13, 1.0, %v1575_v14  ;;  %vm382_vm1 = vmand %vm258_vm8, %vm322_vm9  ;;  %vm353_vm3 = vcmp.lt.s32.totalorder %v164_v40, %v1627_v10  ;;  %v166_v48 = vadd.s32 456, %v1611_v1  ;;  %vm260_vm5 = vcmp.ge.s32.totalorder %v135_v42, %v1622_v9  ;;  %v50_v40 = vld [vmem:[#allocation2 + $0x30] sm:$0xff] }
  0x54   :  { %1486 = vmatmul.mubr.msk.f32.gmra.mxu1 %vm538_vm0, %v1277_v47  ;;  %v1248_v49 = vsel %vm382_vm1, 1.0, %v1575_v14  ;;  %vm412_vm4 = vmand %vm288_vm11, %vm352_vm12  ;;  %vm324_vm6 = vcmp.lt.s32.totalorder %v135_v42, %v1627_v10  ;;  %v137_v50 = vadd.s32 224, %v1611_v1  ;;  %vm290_vm8 = vcmp.ge.s32.totalorder %v165_v44, %v1622_v9 }
  0x55   :  { %1443 = vmatprep.mubr.msk.f32.mxu0 %vm538_vm0, %v1248_v49  ;;  %v1278_v51 = vsel %vm412_vm4, 1.0, %v1575_v14  ;;  %vm383_vm7 = vmand %vm259_vm14, %vm323_vm15  ;;  %vm354_vm9 = vcmp.lt.s32.totalorder %v165_v44, %v1627_v10  ;;  %v167_v52 = vadd.s32 464, %v1611_v1  ;;  %vm261_vm11 = vcmp.ge.s32.totalorder %v136_v46, %v1622_v9  ;;  %v83_v49 = vld [vmem:[#allocation2 + $0x138] sm:$0xff] }
  0x56   :  { %1488 = vmatprep.mubr.msk.f32.mxu1 %vm538_vm0, %v1278_v51  ;;  %v1249_v53 = vsel %vm383_vm7, 1.0, %v1575_v14  ;;  %vm413_vm10 = vmand %vm289_vm2, %vm353_vm3  ;;  %vm325_vm12 = vcmp.lt.s32.totalorder %v136_v46, %v1627_v10  ;;  %v138_v54 = vadd.s32 232, %v1611_v1  ;;  %vm291_vm14 = vcmp.ge.s32.totalorder %v166_v48, %v1622_v9  ;;  %v53_v46 = vld [vmem:[#allocation2 + $0x48] sm:$0xff] }
  0x57   :  { %1444 = vmatmul.mubr.msk.f32.gmra.mxu0 %vm538_vm0, %v1249_v53  ;;  %v1279_v55 = vsel %vm413_vm10, 1.0, %v1575_v14  ;;  %vm384_vm13 = vmand %vm260_vm5, %vm324_vm6  ;;  %vm355_vm15 = vcmp.lt.s32.totalorder %v166_v48, %v1627_v10  ;;  %v168_v56 = vadd.s32 472, %v1611_v1  ;;  %vm262_vm2 = vcmp.ge.s32.totalorder %v137_v50, %v1622_v9 }
  0x58   :  { %1489 = vmatmul.mubr.msk.f32.gmra.mxu1 %vm538_vm0, %v1279_v55  ;;  %v1250_v57 = vsel %vm384_vm13, 1.0, %v1575_v14  ;;  %vm414_vm1 = vmand %vm290_vm8, %vm354_vm9  ;;  %vm326_vm3 = vcmp.lt.s32.totalorder %v137_v50, %v1627_v10  ;;  %vm292_vm5 = vcmp.ge.s32.totalorder %v167_v52, %v1622_v9  ;;  %vm356_vm6 = vcmp.lt.s32.totalorder %v167_v52, %v1627_v10  ;;  %v52_v52 = vld [vmem:[#allocation2 + $0x40] sm:$0xff]  ;;  %v82_v55 = vld [vmem:[#allocation2 + $0x130] sm:$0xff] }
  0x59   :  { %1446 = vmatprep.mubr.msk.f32.mxu0 %vm538_vm0, %v1250_v57  ;;  %v1280_v58 = vsel %vm414_vm1, 1.0, %v1575_v14  ;;  %vm385_vm4 = vmand %vm261_vm11, %vm325_vm12  ;;  %vm263_vm8 = vcmp.ge.s32.totalorder %v138_v54, %v1622_v9  ;;  %vm327_vm9 = vcmp.lt.s32.totalorder %v138_v54, %v1627_v10  ;;  %vm293_vm11 = vcmp.ge.s32.totalorder %v168_v56, %v1622_v9 }
  0x5a   :  { %1491 = vmatprep.mubr.msk.f32.mxu1 %vm538_vm0, %v1280_v58  ;;  %v1251_v1 = vsel %vm385_vm4, 1.0, %v1575_v14  ;;  %vm415_vm7 = vmand %vm291_vm14, %vm355_vm15  ;;  %vm357_vm12 = vcmp.lt.s32.totalorder %v168_v56, %v1627_v10  ;;  %v45_v10 = vld [vmem:[#allocation2 + $0x8] sm:$0xff]  ;;  %v55_v58 = vld [vmem:[#allocation2 + $0x58] sm:$0xff] }
  0x5b   :  { %1447 = vmatmul.mubr.msk.f32.gmra.mxu0 %vm538_vm0, %v1251_v1  ;;  %v1281_v59 = vsel %vm415_vm7, 1.0, %v1575_v14  ;;  %vm386_vm10 = vmand %vm262_vm2, %vm326_vm3 }
  0x5c   :  { %1492 = vmatmul.mubr.msk.f32.gmra.mxu1 %vm538_vm0, %v1281_v59  ;;  %v1252_v60 = vsel %vm386_vm10, 1.0, %v1575_v14  ;;  %vm416_vm13 = vmand %vm292_vm5, %vm356_vm6 }
  0x5d   :  { %1449 = vmatprep.mubr.msk.f32.mxu0 %vm538_vm0, %v1252_v60  ;;  %v1282_v61 = vsel %vm416_vm13, 1.0, %v1575_v14  ;;  %vm387_vm14 = vmand %vm263_vm8, %vm327_vm9  ;;  %v85_v60 = vld [vmem:[#allocation2 + $0x148] sm:$0xff] }
  0x5e   :  { %1494 = vmatprep.mubr.msk.f32.mxu1 %vm538_vm0, %v1282_v61  ;;  %v1253_v62 = vsel %vm387_vm14, 1.0, %v1575_v14  ;;  %vm417_vm15 = vmand %vm293_vm11, %vm357_vm12 }
  0x5f   :  { %1450 = vmatmul.mubr.msk.f32.gmra.mxu0 %vm538_vm0, %v1253_v62  ;;  %v1283_v9 = vsel %vm417_vm15, 1.0, %v1575_v14  ;;  %v46_v14 = vld [vmem:[#allocation2 + $0x10] sm:$0xff] }
  0x60   :  { %1495 = vmatmul.mubr.msk.f32.gmra.mxu1 %vm538_vm0, %v1283_v9  ;;  %v54_v9 = vld [vmem:[#allocation2 + $0x50] sm:$0xff] }
  0xe7   :  { %v1409_v0 = vpop.f32.mrf.mxu0 }
  0xe8   :  { %v1085_v3 = vmul.f32 %v1409_v0, %v45_v10  ;;  %v1454_v4 = vpop.f32.mrf.mxu1  ;;  %v84_v0 = vld [vmem:[#allocation2 + $0x140] sm:$0xff] }
  0xe9   :  { %v1115_v6 = vmul.f32 %v1454_v4, %v75_v63  ;;  %v785_v7 = vpop.f32.mrf.mxu0  ;;  %v57_v4 = vld [vmem:[#allocation2 + $0x68] sm:$0xff] }
  0xea   :  { %1145 = vst [vmem:[#allocation7 + $0x8] sm:$0xff] %v1085_v3  ;;  %v1084_v11 = vmul.f32 %v785_v7, %v44_v2  ;;  %v935_v12 = vpop.f32.mrf.mxu1  ;;  %v87_v7 = vld [vmem:[#allocation2 + $0x158] sm:$0xff] }
  0xeb   :  { %1175 = vst [vmem:[#allocation7 + $0xf8] sm:$0xff] %v1115_v6  ;;  %v1114_v15 = vmul.f32 %v935_v12, %v74_v5  ;;  %v1412_v16 = vpop.f32.mrf.mxu0  ;;  %v56_v12 = vld [vmem:[#allocation2 + $0x60] sm:$0xff] }
  0xec   :  { %1144 = vst [vmem:[#allocation7] sm:$0xff] %v1084_v11  ;;  %v1087_v17 = vmul.f32 %v1412_v16, %v47_v8  ;;  %v1457_v18 = vpop.f32.mrf.mxu1  ;;  %v86_v16 = vld [vmem:[#allocation2 + $0x150] sm:$0xff] }
  0xed   :  { %1174 = vst [vmem:[#allocation7 + $0xf0] sm:$0xff] %v1114_v15  ;;  %v1117_v20 = vmul.f32 %v1457_v18, %v77_v13  ;;  %v795_v21 = vpop.f32.mrf.mxu0  ;;  %v59_v18 = vld [vmem:[#allocation2 + $0x78] sm:$0xff] }
  0xee   :  { %1147 = vst [vmem:[#allocation7 + $0x18] sm:$0xff] %v1087_v17  ;;  %v1086_v23 = vmul.f32 %v795_v21, %v46_v14  ;;  %v945_v24 = vpop.f32.mrf.mxu1  ;;  %v89_v21 = vld [vmem:[#allocation2 + $0x168] sm:$0xff] }
  0xef   :  { %1177 = vst [vmem:[#allocation7 + $0x108] sm:$0xff] %v1117_v20  ;;  %v1116_v26 = vmul.f32 %v945_v24, %v76_v19  ;;  %v1415_v27 = vpop.f32.mrf.mxu0  ;;  %v58_v24 = vld [vmem:[#allocation2 + $0x70] sm:$0xff] }
  0xf0   :  { %1146 = vst [vmem:[#allocation7 + $0x10] sm:$0xff] %v1086_v23  ;;  %v1089_v29 = vmul.f32 %v1415_v27, %v49_v22  ;;  %v1460_v30 = vpop.f32.mrf.mxu1  ;;  %v88_v27 = vld [vmem:[#allocation2 + $0x160] sm:$0xff] }
  0xf1   :  { %1176 = vst [vmem:[#allocation7 + $0x100] sm:$0xff] %v1116_v26  ;;  %v1119_v32 = vmul.f32 %v1460_v30, %v79_v25  ;;  %v805_v33 = vpop.f32.mrf.mxu0  ;;  %v61_v30 = vld [vmem:[#allocation2 + $0x88] sm:$0xff] }
  0xf2   :  { %1149 = vst [vmem:[#allocation7 + $0x28] sm:$0xff] %v1089_v29  ;;  %v1088_v35 = vmul.f32 %v805_v33, %v48_v28  ;;  %v955_v36 = vpop.f32.mrf.mxu1  ;;  %v91_v33 = vld [vmem:[#allocation2 + $0x178] sm:$0xff] }
  0xf3   :  { %1179 = vst [vmem:[#allocation7 + $0x118] sm:$0xff] %v1119_v32  ;;  %v1118_v38 = vmul.f32 %v955_v36, %v78_v31  ;;  %v1418_v39 = vpop.f32.mrf.mxu0  ;;  %v60_v36 = vld [vmem:[#allocation2 + $0x80] sm:$0xff] }
  0xf4   :  { %1148 = vst [vmem:[#allocation7 + $0x20] sm:$0xff] %v1088_v35  ;;  %v1091_v41 = vmul.f32 %v1418_v39, %v51_v34  ;;  %v1463_v42 = vpop.f32.mrf.mxu1  ;;  %v90_v39 = vld [vmem:[#allocation2 + $0x170] sm:$0xff] }
  0xf5   :  { %1178 = vst [vmem:[#allocation7 + $0x110] sm:$0xff] %v1118_v38  ;;  %v1121_v44 = vmul.f32 %v1463_v42, %v81_v37  ;;  %v815_v45 = vpop.f32.mrf.mxu0  ;;  %v63_v42 = vld [vmem:[#allocation2 + $0x98] sm:$0xff] }
  0xf6   :  { %1151 = vst [vmem:[#allocation7 + $0x38] sm:$0xff] %v1091_v41  ;;  %v1090_v47 = vmul.f32 %v815_v45, %v50_v40  ;;  %v965_v48 = vpop.f32.mrf.mxu1  ;;  %v93_v45 = vld [vmem:[#allocation2 + $0x188] sm:$0xff] }
  0xf7   :  { %1181 = vst [vmem:[#allocation7 + $0x128] sm:$0xff] %v1121_v44  ;;  %v1120_v50 = vmul.f32 %v965_v48, %v80_v43  ;;  %v1421_v51 = vpop.f32.mrf.mxu0  ;;  %v62_v48 = vld [vmem:[#allocation2 + $0x90] sm:$0xff] }
  0xf8   :  { %1150 = vst [vmem:[#allocation7 + $0x30] sm:$0xff] %v1090_v47  ;;  %v1093_v53 = vmul.f32 %v1421_v51, %v53_v46  ;;  %v1466_v54 = vpop.f32.mrf.mxu1  ;;  %v92_v51 = vld [vmem:[#allocation2 + $0x180] sm:$0xff] }
  0xf9   :  { %1180 = vst [vmem:[#allocation7 + $0x120] sm:$0xff] %v1120_v50  ;;  %v1123_v56 = vmul.f32 %v1466_v54, %v83_v49  ;;  %v825_v57 = vpop.f32.mrf.mxu0  ;;  %v65_v54 = vld [vmem:[#allocation2 + $0xa8] sm:$0xff] }
  0xfa   :  { %1153 = vst [vmem:[#allocation7 + $0x48] sm:$0xff] %v1093_v53  ;;  %v1092_v1 = vmul.f32 %v825_v57, %v52_v52  ;;  %v975_v59 = vpop.f32.mrf.mxu1  ;;  %v95_v57 = vld [vmem:[#allocation2 + $0x198] sm:$0xff] }
  0xfb   :  { %1183 = vst [vmem:[#allocation7 + $0x138] sm:$0xff] %v1123_v56  ;;  %v1122_v61 = vmul.f32 %v975_v59, %v82_v55  ;;  %v1424_v62 = vpop.f32.mrf.mxu0  ;;  %v64_v59 = vld [vmem:[#allocation2 + $0xa0] sm:$0xff] }
  0xfc   :  { %1152 = vst [vmem:[#allocation7 + $0x40] sm:$0xff] %v1092_v1  ;;  %v1095_v10 = vmul.f32 %v1424_v62, %v55_v58  ;;  %v1469_v63 = vpop.f32.mrf.mxu1  ;;  %v94_v62 = vld [vmem:[#allocation2 + $0x190] sm:$0xff] }
  0xfd   :  { %1182 = vst [vmem:[#allocation7 + $0x130] sm:$0xff] %v1122_v61  ;;  %v1125_v2 = vmul.f32 %v1469_v63, %v85_v60  ;;  %v835_v3 = vpop.f32.mrf.mxu0  ;;  %v67_v63 = vld [vmem:[#allocation2 + $0xb8] sm:$0xff] }
  0xfe   :  { %1155 = vst [vmem:[#allocation7 + $0x58] sm:$0xff] %v1095_v10  ;;  %v1094_v5 = vmul.f32 %v835_v3, %v54_v9  ;;  %v985_v6 = vpop.f32.mrf.mxu1  ;;  %v97_v3 = vld [vmem:[#allocation2 + $0x1a8] sm:$0xff] }
  0xff   :  { %1185 = vst [vmem:[#allocation7 + $0x148] sm:$0xff] %v1125_v2  ;;  %v1124_v8 = vmul.f32 %v985_v6, %v84_v0  ;;  %v1427_v11 = vpop.f32.mrf.mxu0  ;;  %v66_v6 = vld [vmem:[#allocation2 + $0xb0] sm:$0xff] }
 0x100   :  { %1154 = vst [vmem:[#allocation7 + $0x50] sm:$0xff] %v1094_v5  ;;  %v1097_v13 = vmul.f32 %v1427_v11, %v57_v4  ;;  %v1472_v15 = vpop.f32.mrf.mxu1  ;;  %v96_v11 = vld [vmem:[#allocation2 + $0x1a0] sm:$0xff] }
 0x101   :  { %1184 = vst [vmem:[#allocation7 + $0x140] sm:$0xff] %v1124_v8  ;;  %v1127_v14 = vmul.f32 %v1472_v15, %v87_v7  ;;  %v845_v17 = vpop.f32.mrf.mxu0  ;;  %v69_v15 = vld [vmem:[#allocation2 + $0xc8] sm:$0xff] }
 0x102   :  { %1157 = vst [vmem:[#allocation7 + $0x68] sm:$0xff] %v1097_v13  ;;  %v1096_v19 = vmul.f32 %v845_v17, %v56_v12  ;;  %v995_v20 = vpop.f32.mrf.mxu1  ;;  %v99_v17 = vld [vmem:[#allocation2 + $0x1b8] sm:$0xff] }
 0x103   :  { %1187 = vst [vmem:[#allocation7 + $0x158] sm:$0xff] %v1127_v14  ;;  %v1126_v22 = vmul.f32 %v995_v20, %v86_v16  ;;  %v1430_v23 = vpop.f32.mrf.mxu0  ;;  %v68_v20 = vld [vmem:[#allocation2 + $0xc0] sm:$0xff] }
 0x104   :  { %1156 = vst [vmem:[#allocation7 + $0x60] sm:$0xff] %v1096_v19  ;;  %v1099_v25 = vmul.f32 %v1430_v23, %v59_v18  ;;  %v1475_v26 = vpop.f32.mrf.mxu1  ;;  %v98_v23 = vld [vmem:[#allocation2 + $0x1b0] sm:$0xff] }
 0x105   :  { %1186 = vst [vmem:[#allocation7 + $0x150] sm:$0xff] %v1126_v22  ;;  %v1129_v28 = vmul.f32 %v1475_v26, %v89_v21  ;;  %v855_v29 = vpop.f32.mrf.mxu0  ;;  %v71_v26 = vld [vmem:[#allocation2 + $0xd8] sm:$0xff] }
 0x106   :  { %1159 = vst [vmem:[#allocation7 + $0x78] sm:$0xff] %v1099_v25  ;;  %v1098_v31 = vmul.f32 %v855_v29, %v58_v24  ;;  %v1005_v32 = vpop.f32.mrf.mxu1  ;;  %v101_v29 = vld [vmem:[#allocation2 + $0x1c8] sm:$0xff] }
 0x107   :  { %1189 = vst [vmem:[#allocation7 + $0x168] sm:$0xff] %v1129_v28  ;;  %v1128_v34 = vmul.f32 %v1005_v32, %v88_v27  ;;  %v1433_v35 = vpop.f32.mrf.mxu0  ;;  %v70_v32 = vld [vmem:[#allocation2 + $0xd0] sm:$0xff] }
 0x108   :  { %1158 = vst [vmem:[#allocation7 + $0x70] sm:$0xff] %v1098_v31  ;;  %v1101_v37 = vmul.f32 %v1433_v35, %v61_v30  ;;  %v1478_v38 = vpop.f32.mrf.mxu1  ;;  %v100_v35 = vld [vmem:[#allocation2 + $0x1c0] sm:$0xff] }
 0x109   :  { %1188 = vst [vmem:[#allocation7 + $0x160] sm:$0xff] %v1128_v34  ;;  %v1131_v40 = vmul.f32 %v1478_v38, %v91_v33  ;;  %v865_v41 = vpop.f32.mrf.mxu0  ;;  %v73_v38 = vld [vmem:[#allocation2 + $0xe8] sm:$0xff] }
 0x10a   :  { %1161 = vst [vmem:[#allocation7 + $0x88] sm:$0xff] %v1101_v37  ;;  %v1100_v43 = vmul.f32 %v865_v41, %v60_v36  ;;  %v1015_v44 = vpop.f32.mrf.mxu1  ;;  %v103_v41 = vld [vmem:[#allocation2 + $0x1d8] sm:$0x1] }
 0x10b   :  { %1191 = vst [vmem:[#allocation7 + $0x178] sm:$0xff] %v1131_v40  ;;  %v1130_v46 = vmul.f32 %v1015_v44, %v90_v39  ;;  %v1436_v47 = vpop.f32.mrf.mxu0  ;;  %v72_v44 = vld [vmem:[#allocation2 + $0xe0] sm:$0xff] }
 0x10c   :  { %1160 = vst [vmem:[#allocation7 + $0x80] sm:$0xff] %v1100_v43  ;;  %v1103_v49 = vmul.f32 %v1436_v47, %v63_v42  ;;  %v1481_v50 = vpop.f32.mrf.mxu1  ;;  %v102_v47 = vld [vmem:[#allocation2 + $0x1d0] sm:$0xff] }
 0x10d   :  { %1190 = vst [vmem:[#allocation7 + $0x170] sm:$0xff] %v1130_v46  ;;  %v1133_v52 = vmul.f32 %v1481_v50, %v93_v45  ;;  %v875_v53 = vpop.f32.mrf.mxu0 }
 0x10e   :  { %1163 = vst [vmem:[#allocation7 + $0x98] sm:$0xff] %v1103_v49  ;;  %v1102_v55 = vmul.f32 %v875_v53, %v62_v48  ;;  %v1025_v56 = vpop.f32.mrf.mxu1 }
 0x10f   :  { %1193 = vst [vmem:[#allocation7 + $0x188] sm:$0xff] %v1133_v52  ;;  %v1132_v58 = vmul.f32 %v1025_v56, %v92_v51  ;;  %v1439_v1 = vpop.f32.mrf.mxu0 }
 0x110   :  { %1162 = vst [vmem:[#allocation7 + $0x90] sm:$0xff] %v1102_v55  ;;  %v1105_v60 = vmul.f32 %v1439_v1, %v65_v54  ;;  %v1484_v61 = vpop.f32.mrf.mxu1 }
 0x111   :  { %1192 = vst [vmem:[#allocation7 + $0x180] sm:$0xff] %v1132_v58  ;;  %v1135_v9 = vmul.f32 %v1484_v61, %v95_v57  ;;  %v885_v10 = vpop.f32.mrf.mxu0 }
 0x112   :  { %1165 = vst [vmem:[#allocation7 + $0xa8] sm:$0xff] %v1105_v60  ;;  %v1104_v0 = vmul.f32 %v885_v10, %v64_v59  ;;  %v1035_v2 = vpop.f32.mrf.mxu1 }
 0x113   :  { %1195 = vst [vmem:[#allocation7 + $0x198] sm:$0xff] %v1135_v9  ;;  %v1134_v4 = vmul.f32 %v1035_v2, %v94_v62  ;;  %v1442_v5 = vpop.f32.mrf.mxu0 }
 0x114   :  { %1164 = vst [vmem:[#allocation7 + $0xa0] sm:$0xff] %v1104_v0  ;;  %v1107_v7 = vmul.f32 %v1442_v5, %v67_v63  ;;  %v1487_v8 = vpop.f32.mrf.mxu1 }
 0x115   :  { %1194 = vst [vmem:[#allocation7 + $0x190] sm:$0xff] %v1134_v4  ;;  %v1137_v12 = vmul.f32 %v1487_v8, %v97_v3  ;;  %v895_v13 = vpop.f32.mrf.mxu0 }
 0x116   :  { %1167 = vst [vmem:[#allocation7 + $0xb8] sm:$0xff] %v1107_v7  ;;  %v1106_v16 = vmul.f32 %v895_v13, %v66_v6  ;;  %v1045_v14 = vpop.f32.mrf.mxu1 }
 0x117   :  { %1197 = vst [vmem:[#allocation7 + $0x1a8] sm:$0xff] %v1137_v12  ;;  %v1136_v18 = vmul.f32 %v1045_v14, %v96_v11  ;;  %v1445_v19 = vpop.f32.mrf.mxu0 }
 0x118   :  { %1166 = vst [vmem:[#allocation7 + $0xb0] sm:$0xff] %v1106_v16  ;;  %v1109_v21 = vmul.f32 %v1445_v19, %v69_v15  ;;  %v1490_v22 = vpop.f32.mrf.mxu1 }
 0x119   :  { %1196 = vst [vmem:[#allocation7 + $0x1a0] sm:$0xff] %v1136_v18  ;;  %v1139_v24 = vmul.f32 %v1490_v22, %v99_v17  ;;  %v905_v25 = vpop.f32.mrf.mxu0 }
 0x11a   :  { %1169 = vst [vmem:[#allocation7 + $0xc8] sm:$0xff] %v1109_v21  ;;  %v1108_v27 = vmul.f32 %v905_v25, %v68_v20  ;;  %v1055_v28 = vpop.f32.mrf.mxu1 }
 0x11b   :  { %1199 = vst [vmem:[#allocation7 + $0x1b8] sm:$0xff] %v1139_v24  ;;  %v1138_v30 = vmul.f32 %v1055_v28, %v98_v23  ;;  %v1448_v31 = vpop.f32.mrf.mxu0 }
 0x11c   :  { %1168 = vst [vmem:[#allocation7 + $0xc0] sm:$0xff] %v1108_v27  ;;  %v1111_v33 = vmul.f32 %v1448_v31, %v71_v26  ;;  %v1493_v34 = vpop.f32.mrf.mxu1 }
 0x11d   :  { %1198 = vst [vmem:[#allocation7 + $0x1b0] sm:$0xff] %v1138_v30  ;;  %v1141_v36 = vmul.f32 %v1493_v34, %v101_v29  ;;  %v915_v37 = vpop.f32.mrf.mxu0 }
 0x11e   :  { %1171 = vst [vmem:[#allocation7 + $0xd8] sm:$0xff] %v1111_v33  ;;  %v1110_v39 = vmul.f32 %v915_v37, %v70_v32  ;;  %v1065_v40 = vpop.f32.mrf.mxu1 }
 0x11f   :  { %1201 = vst [vmem:[#allocation7 + $0x1c8] sm:$0xff] %v1141_v36  ;;  %v1140_v42 = vmul.f32 %v1065_v40, %v100_v35  ;;  %v1451_v43 = vpop.f32.mrf.mxu0 }
 0x120   :  { %1170 = vst [vmem:[#allocation7 + $0xd0] sm:$0xff] %v1110_v39  ;;  %v1113_v45 = vmul.f32 %v1451_v43, %v73_v38  ;;  %v1496_v46 = vpop.f32.mrf.mxu1 }
 0x121   :  { %1200 = vst [vmem:[#allocation7 + $0x1c0] sm:$0xff] %v1140_v42  ;;  %v1143_v48 = vmul.f32 %v1496_v46, %v103_v41  ;;  %v925_v49 = vpop.f32.mrf.mxu0 }
 0x122   :  { %1173 = vst [vmem:[#allocation7 + $0xe8] sm:$0xff] %v1113_v45  ;;  %v1112_v50 = vmul.f32 %v925_v49, %v72_v44  ;;  %v1075_v51 = vpop.f32.mrf.mxu1 }
 0x123   :  { %1203 = vst [vmem:[#allocation7 + $0x1d8] sm:$0x1] %v1143_v48  ;;  %v1142_v52 = vmul.f32 %v1075_v51, %v102_v47 }
 0x124   :  { %1172 = vst [vmem:[#allocation7 + $0xe0] sm:$0xff] %v1112_v50 }
 0x125   :  { %1202 = vst [vmem:[#allocation7 + $0x1d0] sm:$0xff] %v1142_v52 }
 0x126   :  { %1556 = shalt.err (!%p1553_p0)
}
 0x127   :  { %1215 = dma.vmem_to_hbm [thread:$0]  %s1210_s3, 7680, %s2138_s4, [#allocation4], %s1572_s18, %s1572_s18, %s1573_s19  }
 0x128   :  { %1569 = dma.done.wait [#allocation4], 7680  }
 0x129   :  { %1570 = vsyncadd [#allocation4], 4294959616 }
 0x12a   :  { %1219 = vsyncpa [#allocation3], 1 }
 0x12b   :  { %1220 = vsyncpa [#allocation6], 1 }
 0x12c   :  { %1221 = vsyncpa [#allocation4], 1 }

</bundles_post_ra>
